<compile_context>
chip_gen: v6e
topology: v6e:2x2x1
jax: 0.10.0
libtpu: 0.0.40
codegen_flags: <defaults>
</compile_context>

<pallas_src>
import math

import jax
import jax.numpy as jnp
from jax.experimental import pallas as pl
from jax.experimental.pallas import tpu as pltpu

_EPS = 1e-6
_LANES = 128

# ---------------------------------------------------------------------------
# lgamma via Lanczos (g=7, n=9), valid for z >= 0.5.  Here z = b + 1 >= 1
# (b = true / H_T_1 >= 0 for count data), so no reflection branch is needed.
# TODO(synk): reflection formula for z < 0.5 (torch.lgamma supports it) not implemented.
# The partial-fraction sum c0 + sum_i c_i/(z-1+i) is pre-collapsed into a single
# rational polynomial P(zm1)/Q(zm1) so only one reciprocal is needed per element.
# ---------------------------------------------------------------------------
_LANCZOS_G = 7.0
_LANCZOS_COEFS = (
    0.99999999999980993,
    676.5203681218851,
    -1259.1392167224028,
    771.32342877765313,
    -176.61502916214059,
    12.507343278686905,
    -0.13857109526572012,
    9.9843695780195716e-6,
    1.5056327351493116e-7,
)
_HALF_LOG_2PI = 0.5 * math.log(2.0 * math.pi)


def _poly_mul(a, b):
    out = [0.0] * (len(a) + len(b) - 1)
    for i, ai in enumerate(a):
        for j, bj in enumerate(b):
            out[i + j] += ai * bj
    return out


def _build_lanczos_rational():
    # Coefficient lists are lowest-degree first while building.
    q = [1.0]
    for i in range(1, 9):
        q = _poly_mul(q, [float(i), 1.0])            # Q(x) = prod_{i=1..8} (x + i)
    p = [c * _LANCZOS_COEFS[0] for c in q]           # c0 * Q(x)
    for i in range(1, 9):
        term = [1.0]
        for j in range(1, 9):
            if j != i:
                term = _poly_mul(term, [float(j), 1.0])
        for k, c in enumerate(term):
            p[k] += c * _LANCZOS_COEFS[i]            # + c_i * prod_{j!=i}(x + j)
    # Return highest-degree first for Horner evaluation.
    return tuple(reversed(p)), tuple(reversed(q))


_LGAMMA_P, _LGAMMA_Q = _build_lanczos_rational()


def _fast_recip(x):
    """1/x via EUP approximate reciprocal + one Newton step (VALU)."""
    r = pl.reciprocal(x, approx=True)
    return r * (2.0 - x * r)


def _horner(x, coefs):
    acc = jnp.full_like(x, coefs[0])
    for c in coefs[1:]:
        acc = acc * x + c
    return acc


def _lgamma_zm1(zm1):
    """Elementwise lgamma(zm1 + 1) for zm1 >= -0.5 (here zm1 = b >= 0)."""
    t = zm1 + (_LANCZOS_G + 0.5)
    num = _horner(zm1, _LGAMMA_P)
    den = _horner(zm1, _LGAMMA_Q)
    a = num * _fast_recip(den)   # TODO(synk): Horner in f32 overflows for zm1 >~ 4e4
    return _HALF_LOG_2PI + (zm1 + 0.5) * jnp.log(t) - t + jnp.log(a)


def _lgamma_zm1_py(zm1):
    """Python/double evaluation of the same Lanczos rational (epilogue constant)."""
    t = zm1 + _LANCZOS_G + 0.5
    num = 0.0
    for c in _LGAMMA_P:
        num = num * zm1 + c
    den = 0.0
    for c in _LGAMMA_Q:
        den = den * zm1 + c
    return _HALF_LOG_2PI + (zm1 + 0.5) * math.log(t) - t + math.log(num / den)


# Poisson-term contribution of one padded element (p = 0, t = 0, h = 1):
#   b = eps, Ax = eps  ->  log(eps)*eps - eps - lgamma(1 + eps)
_PXB_PAD = math.log(_EPS) * _EPS - _EPS - _lgamma_zm1_py(_EPS)


def _default_n_par():
    """2-way grid split only on dual-TensorCore parts (v7x); 1 elsewhere."""
    try:
        kind = jax.devices()[0].device_kind.lower()
    except Exception:
        return 1
    return 2 if ("v7" in kind or "7x" in kind) else 1


# ---------------------------------------------------------------------------
# Kernel
# ---------------------------------------------------------------------------
def _make_kernel(block_rows):
    def kernel(p_ref, t_ref, h_ref, out_ref, acc_sq_ref, acc_ab_ref, acc_ll_ref):
        i = pl.program_id(1)

        @pl.when(i == 0)
        def _init():
            acc_sq_ref[...] = jnp.zeros_like(acc_sq_ref)
            acc_ab_ref[...] = jnp.zeros_like(acc_ab_ref)
            acc_ll_ref[...] = jnp.zeros_like(acc_ll_ref)

        p = p_ref[...]
        t = t_ref[...]
        h = h_ref[...]

        # L2 / L1 terms: the +1e-6 on both args cancels in the difference.
        # Padded tail (p = t = 0) contributes exactly 0, so no masking needed.
        d = p - t
        sq = d * d
        ab = jnp.abs(d)

        # Poisson log-likelihood term: b = true/H_T_1 + eps, Ax = pred/H_T_1 + eps.
        # Padded tail (p = 0, t = 0, h = 1) contributes the constant _PXB_PAD per
        # element, subtracted analytically in the JAX epilogue.
        inv_h = _fast_recip(h)
        b = t * inv_h + _EPS
        ax = p * inv_h + _EPS
        pxb = jnp.log(ax) * b - ax - _lgamma_zm1(b)

        # Per-step tree reduce to an (8,128) partial (sublane-aligned reshape,
        # leading-axis sum -> pure vreg VALU adds), then accumulate into small
        # VMEM scratch.  Keeps the hot loop off the vector load/store slots.
        # TODO(synk): on v7x the idle MXU could do this reduce (ones(8,br) @ x)
        # if a bundle dump shows VALU as the binding slot.
        def red(x):
            return x.reshape(block_rows // 8, 8, _LANES).sum(axis=0)

        acc_sq_ref[...] += red(sq)
        acc_ab_ref[...] += red(ab)
        acc_ll_ref[...] += red(pxb)

        @pl.when(i == pl.num_programs(1) - 1)
        def _finalize():
            out_ref[0, 0] = acc_sq_ref[...]
            out_ref[0, 1] = acc_ab_ref[...]
            out_ref[0, 2] = acc_ll_ref[...]

    return kernel


def l1_l2_mle_loss(predictions, true, h_t_1, *, block_rows=1024, n_par=None):
    """Pallas-backed forward pass of L1_and_L2_and_MLE.  Inputs are flat (N,)."""
    n = int(predictions.size)
    if n_par is None:
        n_par = _default_n_par()

    rows = -(-n // _LANES)                                   # ceil(n / 128)
    # Effective block_rows: as large as requested, shrunk for tiny inputs,
    # rounded up to a multiple of 8 (sublane granularity).
    br = max(8, min(int(block_rows), -(-rows // n_par)))
    br = -(-br // 8) * 8
    n_inner = max(1, -(-rows // (n_par * br)))
    padded_rows = n_par * n_inner * br
    padded_n = padded_rows * _LANES
    pad_count = padded_n - n

    def pad(x, fill):
        x = x.reshape(-1).astype(jnp.float32)
        if pad_count:
            x = jnp.concatenate(
                [x, jnp.full((pad_count,), fill, dtype=jnp.float32)]
            )
        return x.reshape(padded_rows, _LANES)

    p2 = pad(predictions, 0.0)
    t2 = pad(true, 0.0)
    h2 = pad(h_t_1, 1.0)   # pad with 1 so the padded 1/h stays finite

    in_blk = pl.BlockSpec((br, _LANES), lambda c, i: (c * n_inner + i, 0))
    out_blk = pl.BlockSpec((1, 3, 8, _LANES), lambda c, i: (c, 0, 0, 0))

    partials = pl.pallas_call(
        _make_kernel(br),
        out_shape=jax.ShapeDtypeStruct((n_par, 3, 8, _LANES), jnp.float32),
        grid_spec=pltpu.PrefetchScalarGridSpec(
            num_scalar_prefetch=0,
            grid=(n_par, n_inner),
            in_specs=[in_blk, in_blk, in_blk],
            out_specs=out_blk,
            scratch_shapes=[
                pltpu.VMEM((8, _LANES), jnp.float32),
                pltpu.VMEM((8, _LANES), jnp.float32),
                pltpu.VMEM((8, _LANES), jnp.float32),
            ],
        ),
        compiler_params=pltpu.CompilerParams(
            dimension_semantics=("parallel", "arbitrary"),
        ),
    )(p2, t2, h2)

    sums = jnp.sum(partials, axis=(0, 2, 3))  # (3,): sum_sq, sum_abs, sum_loglik
    nf = jnp.float32(n)
    rmse = jnp.sqrt(sums[0] / nf)             # sqrt(mse_loss)
    l1 = sums[1] / nf                         # l1_loss
    # Remove the padded-tail contribution from the Poisson term analytically.
    sum_ll = sums[2] - jnp.float32(pad_count * _PXB_PAD)
    neg_ll = -sum_ll                          # log_liklihood_x_given_b(...)
    return rmse + l1 + jnp.log(neg_ll)        # ... .log()


def _reference_loss(predictions, true, h_t_1):
    """Pure-JAX reference of the PyTorch forward (for a sanity check)."""
    from jax.scipy.special import gammaln

    p = predictions + _EPS
    t = true + _EPS
    rmse = jnp.sqrt(jnp.mean((p - t) ** 2))
    l1 = jnp.mean(jnp.abs(p - t))
    b = true / h_t_1 + _EPS
    ax = predictions / h_t_1 + _EPS
    pxb = jnp.log(ax) * b - ax - gammaln(b + 1.0)
    return rmse + l1 + jnp.log(-jnp.sum(pxb))


if __name__ == "__main__":
    key = jax.random.PRNGKey(0)
    k_h, k_t, k_p = jax.random.split(key, 3)

    # Synthetic deterministic stand-ins for the globals of pytorch_Hx.py:
    #   H            : (M, N) positive measurement matrix
    #   H_T_1        : H^T @ ones(M)               -> (N,)
    #   true         : Poisson counts (astro_blur) -> (N,)
    #   predictions  : positive reconstruction     -> (N,)
    M, N = 64, 2048
    H = jax.random.uniform(k_h, (M, N), dtype=jnp.float32, minval=0.1, maxval=1.0)
    h_t_1 = jnp.sum(H, axis=0)
    true = jax.random.poisson(k_t, 20.0, (N,)).astype(jnp.float32)
    predictions = jax.random.uniform(k_p, (N,), dtype=jnp.float32, minval=5.0, maxval=40.0)

    loss = jax.block_until_ready(l1_l2_mle_loss(predictions, true, h_t_1))
    ref = _reference_loss(predictions, true, h_t_1)
    assert jnp.isfinite(loss), loss
    assert jnp.allclose(loss, ref, rtol=5e-2, atol=5e-2), (loss, ref)

    # Second case: N not a multiple of the tile -> exercises padding + the
    # analytic padded-tail correction in the epilogue.
    N2 = 2000
    loss2 = jax.block_until_ready(
        l1_l2_mle_loss(predictions[:N2], true[:N2], h_t_1[:N2])
    )
    ref2 = _reference_loss(predictions[:N2], true[:N2], h_t_1[:N2])
    assert jnp.isfinite(loss2), loss2
    assert jnp.allclose(loss2, ref2, rtol=5e-2, atol=5e-2), (loss2, ref2)

    print("KERNEL_OK")
</pallas_src>

<mosaic_0001>
module attributes {stable_mosaic.version = 11 : i64} {
  func.func @kernel(%arg0: i32, %arg1: i32, %arg2: memref<16x128xf32, #tpu.memory_space<vmem>>, %arg3: memref<16x128xf32, #tpu.memory_space<vmem>>, %arg4: memref<16x128xf32, #tpu.memory_space<vmem>>, %arg5: memref<1x3x8x128xf32, #tpu.memory_space<vmem>>, %arg6: memref<8x128xf32, #tpu.memory_space<vmem>>, %arg7: memref<8x128xf32, #tpu.memory_space<vmem>>, %arg8: memref<8x128xf32, #tpu.memory_space<vmem>>) attributes {dimension_semantics = [#tpu.dimension_semantics<parallel>, #tpu.dimension_semantics<arbitrary>], iteration_bounds = array<i64: 1, 1>, scalar_prefetch = 0 : i64, scratch_operands = 3 : i64, tpu.core_type = #tpu.core_type<tc>, window_params = [{transform_indices = @transform_0, window_bounds = array<i64: 16, 128>}, {transform_indices = @transform_1, window_bounds = array<i64: 16, 128>}, {transform_indices = @transform_2, window_bounds = array<i64: 16, 128>}, {transform_indices = @transform_3, window_bounds = array<i64: 1, 3, 8, 128>}]} {
    %c0_i32 = arith.constant 0 : i32
    %0 = arith.cmpi eq, %arg1, %c0_i32 : i32
    %1 = arith.extui %0 : i1 to i32
    %c0_i32_0 = arith.constant 0 : i32
    %2 = arith.cmpi ne, %1, %c0_i32_0 : i32
    scf.if %2 {
      %cst_47 = arith.constant 0.000000e+00 : f32
      %109 = vector.broadcast %cst_47 : f32 to vector<8x128xf32>
      %c0_48 = arith.constant 0 : index
      %c0_49 = arith.constant 0 : index
      %110 = vector.load %arg6[%c0_48, %c0_49] : memref<8x128xf32, #tpu.memory_space<vmem>>, vector<8x128xf32>
      tpu.vector_store %arg6[%c0_48, %c0_49], %109 {strides = array<i32>} : memref<8x128xf32, #tpu.memory_space<vmem>>, vector<8x128xf32>,
      %cst_50 = arith.constant 0.000000e+00 : f32
      %111 = vector.broadcast %cst_50 : f32 to vector<8x128xf32>
      %c0_51 = arith.constant 0 : index
      %c0_52 = arith.constant 0 : index
      %112 = vector.load %arg7[%c0_51, %c0_52] : memref<8x128xf32, #tpu.memory_space<vmem>>, vector<8x128xf32>
      tpu.vector_store %arg7[%c0_51, %c0_52], %111 {strides = array<i32>} : memref<8x128xf32, #tpu.memory_space<vmem>>, vector<8x128xf32>,
      %cst_53 = arith.constant 0.000000e+00 : f32
      %113 = vector.broadcast %cst_53 : f32 to vector<8x128xf32>
      %c0_54 = arith.constant 0 : index
      %c0_55 = arith.constant 0 : index
      %114 = vector.load %arg8[%c0_54, %c0_55] : memref<8x128xf32, #tpu.memory_space<vmem>>, vector<8x128xf32>
      tpu.vector_store %arg8[%c0_54, %c0_55], %113 {strides = array<i32>} : memref<8x128xf32, #tpu.memory_space<vmem>>, vector<8x128xf32>,
    } else {
    }
    %c0 = arith.constant 0 : index
    %c0_1 = arith.constant 0 : index
    %3 = vector.load %arg2[%c0, %c0_1] : memref<16x128xf32, #tpu.memory_space<vmem>>, vector<16x128xf32>
    %c0_2 = arith.constant 0 : index
    %c0_3 = arith.constant 0 : index
    %4 = vector.load %arg3[%c0_2, %c0_3] : memref<16x128xf32, #tpu.memory_space<vmem>>, vector<16x128xf32>
    %c0_4 = arith.constant 0 : index
    %c0_5 = arith.constant 0 : index
    %5 = vector.load %arg4[%c0_4, %c0_5] : memref<16x128xf32, #tpu.memory_space<vmem>>, vector<16x128xf32>
    %6 = arith.subf %3, %4 : vector<16x128xf32>
    %7 = arith.mulf %6, %6 : vector<16x128xf32>
    %8 = math.absf %6 : vector<16x128xf32>
    %9 = tpu.reciprocal %5 {approx = true} : vector<16x128xf32> -> vector<16x128xf32>
    %10 = arith.mulf %5, %9 : vector<16x128xf32>
    %cst = arith.constant 2.000000e+00 : f32
    %11 = vector.broadcast %cst : f32 to vector<16x128xf32>
    %12 = arith.subf %11, %10 : vector<16x128xf32>
    %13 = arith.mulf %9, %12 : vector<16x128xf32>
    %14 = arith.mulf %4, %13 : vector<16x128xf32>
    %cst_6 = arith.constant 9.99999997E-7 : f32
    %15 = vector.broadcast %cst_6 : f32 to vector<16x128xf32>
    %16 = arith.addf %14, %15 : vector<16x128xf32>
    %17 = arith.mulf %3, %13 : vector<16x128xf32>
    %cst_7 = arith.constant 9.99999997E-7 : f32
    %18 = vector.broadcast %cst_7 : f32 to vector<16x128xf32>
    %19 = arith.addf %17, %18 : vector<16x128xf32>
    %20 = math.log %19 : vector<16x128xf32>
    %21 = arith.mulf %20, %16 : vector<16x128xf32>
    %22 = arith.subf %21, %19 : vector<16x128xf32>
    %cst_8 = arith.constant 7.500000e+00 : f32
    %23 = vector.broadcast %cst_8 : f32 to vector<16x128xf32>
    %24 = arith.addf %16, %23 : vector<16x128xf32>
    %cst_9 = arith.constant 1.000000e+00 : f32
    %25 = vector.broadcast %cst_9 : f32 to vector<16x128xf32>
    %26 = arith.mulf %25, %16 : vector<16x128xf32>
    %cst_10 = arith.constant 60.4583321 : f32
    %27 = vector.broadcast %cst_10 : f32 to vector<16x128xf32>
    %28 = arith.addf %26, %27 : vector<16x128xf32>
    %29 = arith.mulf %28, %16 : vector<16x128xf32>
    %cst_11 = arith.constant 1599.04248 : f32
    %30 = vector.broadcast %cst_11 : f32 to vector<16x128xf32>
    %31 = arith.addf %29, %30 : vector<16x128xf32>
    %32 = arith.mulf %31, %16 : vector<16x128xf32>
    %cst_12 = arith.constant 24165.5098 : f32
    %33 = vector.broadcast %cst_12 : f32 to vector<16x128xf32>
    %34 = arith.addf %32, %33 : vector<16x128xf32>
    %35 = arith.mulf %34, %16 : vector<16x128xf32>
    %cst_13 = arith.constant 228235.219 : f32
    %36 = vector.broadcast %cst_13 : f32 to vector<16x128xf32>
    %37 = arith.addf %35, %36 : vector<16x128xf32>
    %38 = arith.mulf %37, %16 : vector<16x128xf32>
    %cst_14 = arith.constant 1379496.25 : f32
    %39 = vector.broadcast %cst_14 : f32 to vector<16x128xf32>
    %40 = arith.addf %38, %39 : vector<16x128xf32>
    %41 = arith.mulf %40, %16 : vector<16x128xf32>
    %cst_15 = arith.constant 0x4A9F05EA : f32
    %42 = vector.broadcast %cst_15 : f32 to vector<16x128xf32>
    %43 = arith.addf %41, %42 : vector<16x128xf32>
    %44 = arith.mulf %43, %16 : vector<16x128xf32>
    %cst_16 = arith.constant 0x4B2B9D51 : f32
    %45 = vector.broadcast %cst_16 : f32 to vector<16x128xf32>
    %46 = arith.addf %44, %45 : vector<16x128xf32>
    %47 = arith.mulf %46, %16 : vector<16x128xf32>
    %cst_17 = arith.constant 0x4B220ADA : f32
    %48 = vector.broadcast %cst_17 : f32 to vector<16x128xf32>
    %49 = arith.addf %47, %48 : vector<16x128xf32>
    %cst_18 = arith.constant 1.000000e+00 : f32
    %50 = vector.broadcast %cst_18 : f32 to vector<16x128xf32>
    %51 = arith.mulf %50, %16 : vector<16x128xf32>
    %cst_19 = arith.constant 3.600000e+01 : f32
    %52 = vector.broadcast %cst_19 : f32 to vector<16x128xf32>
    %53 = arith.addf %51, %52 : vector<16x128xf32>
    %54 = arith.mulf %53, %16 : vector<16x128xf32>
    %cst_20 = arith.constant 5.460000e+02 : f32
    %55 = vector.broadcast %cst_20 : f32 to vector<16x128xf32>
    %56 = arith.addf %54, %55 : vector<16x128xf32>
    %57 = arith.mulf %56, %16 : vector<16x128xf32>
    %cst_21 = arith.constant 4.536000e+03 : f32
    %58 = vector.broadcast %cst_21 : f32 to vector<16x128xf32>
    %59 = arith.addf %57, %58 : vector<16x128xf32>
    %60 = arith.mulf %59, %16 : vector<16x128xf32>
    %cst_22 = arith.constant 2.244900e+04 : f32
    %61 = vector.broadcast %cst_22 : f32 to vector<16x128xf32>
    %62 = arith.addf %60, %61 : vector<16x128xf32>
    %63 = arith.mulf %62, %16 : vector<16x128xf32>
    %cst_23 = arith.constant 6.728400e+04 : f32
    %64 = vector.broadcast %cst_23 : f32 to vector<16x128xf32>
    %65 = arith.addf %63, %64 : vector<16x128xf32>
    %66 = arith.mulf %65, %16 : vector<16x128xf32>
    %cst_24 = arith.constant 1.181240e+05 : f32
    %67 = vector.broadcast %cst_24 : f32 to vector<16x128xf32>
    %68 = arith.addf %66, %67 : vector<16x128xf32>
    %69 = arith.mulf %68, %16 : vector<16x128xf32>
    %cst_25 = arith.constant 1.095840e+05 : f32
    %70 = vector.broadcast %cst_25 : f32 to vector<16x128xf32>
    %71 = arith.addf %69, %70 : vector<16x128xf32>
    %72 = arith.mulf %71, %16 : vector<16x128xf32>
    %cst_26 = arith.constant 4.032000e+04 : f32
    %73 = vector.broadcast %cst_26 : f32 to vector<16x128xf32>
    %74 = arith.addf %72, %73 : vector<16x128xf32>
    %75 = tpu.reciprocal %74 {approx = true} : vector<16x128xf32> -> vector<16x128xf32>
    %76 = arith.mulf %74, %75 : vector<16x128xf32>
    %cst_27 = arith.constant 2.000000e+00 : f32
    %77 = vector.broadcast %cst_27 : f32 to vector<16x128xf32>
    %78 = arith.subf %77, %76 : vector<16x128xf32>
    %79 = arith.mulf %75, %78 : vector<16x128xf32>
    %80 = arith.mulf %49, %79 : vector<16x128xf32>
    %cst_28 = arith.constant 5.000000e-01 : f32
    %81 = vector.broadcast %cst_28 : f32 to vector<16x128xf32>
    %82 = arith.addf %16, %81 : vector<16x128xf32>
    %83 = math.log %24 : vector<16x128xf32>
    %84 = arith.mulf %82, %83 : vector<16x128xf32>
    %cst_29 = arith.constant 0.918938517 : f32
    %85 = vector.broadcast %cst_29 : f32 to vector<16x128xf32>
    %86 = arith.addf %85, %84 : vector<16x128xf32>
    %87 = arith.subf %86, %24 : vector<16x128xf32>
    %88 = math.log %80 : vector<16x128xf32>
    %89 = arith.addf %87, %88 : vector<16x128xf32>
    %90 = arith.subf %22, %89 : vector<16x128xf32>
    %c0_30 = arith.constant 0 : index
    %c0_31 = arith.constant 0 : index
    %91 = vector.load %arg6[%c0_30, %c0_31] : memref<8x128xf32, #tpu.memory_space<vmem>>, vector<8x128xf32>
    %92 = vector.shape_cast %7 : vector<16x128xf32> to vector<2x8x128xf32>
    %cst_32 = arith.constant dense<0.000000e+00> : vector<8x128xf32>
    %93 = vector.multi_reduction <add>, %92, %cst_32 [0] : vector<2x8x128xf32> to vector<8x128xf32>
    %94 = arith.addf %91, %93 : vector<8x128xf32>
    %c0_33 = arith.constant 0 : index
    %c0_34 = arith.constant 0 : index
    %95 = vector.load %arg6[%c0_33, %c0_34] : memref<8x128xf32, #tpu.memory_space<vmem>>, vector<8x128xf32>
    tpu.vector_store %arg6[%c0_33, %c0_34], %94 {strides = array<i32>} : memref<8x128xf32, #tpu.memory_space<vmem>>, vector<8x128xf32>,
    %c0_35 = arith.constant 0 : index
    %c0_36 = arith.constant 0 : index
    %96 = vector.load %arg7[%c0_35, %c0_36] : memref<8x128xf32, #tpu.memory_space<vmem>>, vector<8x128xf32>
    %97 = vector.shape_cast %8 : vector<16x128xf32> to vector<2x8x128xf32>
    %cst_37 = arith.constant dense<0.000000e+00> : vector<8x128xf32>
    %98 = vector.multi_reduction <add>, %97, %cst_37 [0] : vector<2x8x128xf32> to vector<8x128xf32>
    %99 = arith.addf %96, %98 : vector<8x128xf32>
    %c0_38 = arith.constant 0 : index
    %c0_39 = arith.constant 0 : index
    %100 = vector.load %arg7[%c0_38, %c0_39] : memref<8x128xf32, #tpu.memory_space<vmem>>, vector<8x128xf32>
    tpu.vector_store %arg7[%c0_38, %c0_39], %99 {strides = array<i32>} : memref<8x128xf32, #tpu.memory_space<vmem>>, vector<8x128xf32>,
    %c0_40 = arith.constant 0 : index
    %c0_41 = arith.constant 0 : index
    %101 = vector.load %arg8[%c0_40, %c0_41] : memref<8x128xf32, #tpu.memory_space<vmem>>, vector<8x128xf32>
    %102 = vector.shape_cast %90 : vector<16x128xf32> to vector<2x8x128xf32>
    %cst_42 = arith.constant dense<0.000000e+00> : vector<8x128xf32>
    %103 = vector.multi_reduction <add>, %102, %cst_42 [0] : vector<2x8x128xf32> to vector<8x128xf32>
    %104 = arith.addf %101, %103 : vector<8x128xf32>
    %c0_43 = arith.constant 0 : index
    %c0_44 = arith.constant 0 : index
    %105 = vector.load %arg8[%c0_43, %c0_44] : memref<8x128xf32, #tpu.memory_space<vmem>>, vector<8x128xf32>
    tpu.vector_store %arg8[%c0_43, %c0_44], %104 {strides = array<i32>} : memref<8x128xf32, #tpu.memory_space<vmem>>, vector<8x128xf32>,
    %c0_i32_45 = arith.constant 0 : i32
    %106 = arith.cmpi eq, %arg1, %c0_i32_45 : i32
    %107 = arith.extui %106 : i1 to i32
    %c0_i32_46 = arith.constant 0 : i32
    %108 = arith.cmpi ne, %107, %c0_i32_46 : i32
    scf.if %108 {
      %c0_47 = arith.constant 0 : index
      %c0_48 = arith.constant 0 : index
      %109 = vector.load %arg6[%c0_47, %c0_48] : memref<8x128xf32, #tpu.memory_space<vmem>>, vector<8x128xf32>
      %c0_49 = arith.constant 0 : index
      %c0_50 = arith.constant 0 : index
      %c0_51 = arith.constant 0 : index
      %c0_52 = arith.constant 0 : index
      %110 = vector.load %arg5[%c0_49, %c0_50, %c0_51, %c0_52] : memref<1x3x8x128xf32, #tpu.memory_space<vmem>>, vector<1x1x8x128xf32>
      %111 = vector.shape_cast %110 : vector<1x1x8x128xf32> to vector<8x128xf32>
      %112 = vector.shape_cast %109 : vector<8x128xf32> to vector<1x1x8x128xf32>
      tpu.vector_store %arg5[%c0_49, %c0_50, %c0_51, %c0_52], %112 {strides = array<i32>} : memref<1x3x8x128xf32, #tpu.memory_space<vmem>>, vector<1x1x8x128xf32>,
      %c0_53 = arith.constant 0 : index
      %c0_54 = arith.constant 0 : index
      %113 = vector.load %arg7[%c0_53, %c0_54] : memref<8x128xf32, #tpu.memory_space<vmem>>, vector<8x128xf32>
      %c0_55 = arith.constant 0 : index
      %c1 = arith.constant 1 : index
      %c0_56 = arith.constant 0 : index
      %c0_57 = arith.constant 0 : index
      %114 = vector.load %arg5[%c0_55, %c1, %c0_56, %c0_57] : memref<1x3x8x128xf32, #tpu.memory_space<vmem>>, vector<1x1x8x128xf32>
      %115 = vector.shape_cast %114 : vector<1x1x8x128xf32> to vector<8x128xf32>
      %116 = vector.shape_cast %113 : vector<8x128xf32> to vector<1x1x8x128xf32>
      tpu.vector_store %arg5[%c0_55, %c1, %c0_56, %c0_57], %116 {strides = array<i32>} : memref<1x3x8x128xf32, #tpu.memory_space<vmem>>, vector<1x1x8x128xf32>,
      %c0_58 = arith.constant 0 : index
      %c0_59 = arith.constant 0 : index
      %117 = vector.load %arg8[%c0_58, %c0_59] : memref<8x128xf32, #tpu.memory_space<vmem>>, vector<8x128xf32>
      %c0_60 = arith.constant 0 : index
      %c2 = arith.constant 2 : index
      %c0_61 = arith.constant 0 : index
      %c0_62 = arith.constant 0 : index
      %118 = vector.load %arg5[%c0_60, %c2, %c0_61, %c0_62] : memref<1x3x8x128xf32, #tpu.memory_space<vmem>>, vector<1x1x8x128xf32>
      %119 = vector.shape_cast %118 : vector<1x1x8x128xf32> to vector<8x128xf32>
      %120 = vector.shape_cast %117 : vector<8x128xf32> to vector<1x1x8x128xf32>
      tpu.vector_store %arg5[%c0_60, %c2, %c0_61, %c0_62], %120 {strides = array<i32>} : memref<1x3x8x128xf32, #tpu.memory_space<vmem>>, vector<1x1x8x128xf32>,
    } else {
    }
    return
  }
  func.func @transform_0(%arg0: i32, %arg1: i32) -> (i32, i32) {
    %c1_i32 = arith.constant 1 : i32
    %0 = arith.muli %arg0, %c1_i32 : i32
    %1 = arith.addi %0, %arg1 : i32
    %c0_i32 = arith.constant 0 : i32
    %c0_i32_0 = arith.constant 0 : i32
    return %1, %c0_i32 : i32, i32
  }
  func.func @transform_1(%arg0: i32, %arg1: i32) -> (i32, i32) {
    %c1_i32 = arith.constant 1 : i32
    %0 = arith.muli %arg0, %c1_i32 : i32
    %1 = arith.addi %0, %arg1 : i32
    %c0_i32 = arith.constant 0 : i32
    %c0_i32_0 = arith.constant 0 : i32
    return %1, %c0_i32 : i32, i32
  }
  func.func @transform_2(%arg0: i32, %arg1: i32) -> (i32, i32) {
    %c1_i32 = arith.constant 1 : i32
    %0 = arith.muli %arg0, %c1_i32 : i32
    %1 = arith.addi %0, %arg1 : i32
    %c0_i32 = arith.constant 0 : i32
    %c0_i32_0 = arith.constant 0 : i32
    return %1, %c0_i32 : i32, i32
  }
  func.func @transform_3(%arg0: i32, %arg1: i32) -> (i32, i32, i32, i32) {
    %c0_i32 = arith.constant 0 : i32
    %c0_i32_0 = arith.constant 0 : i32
    %c0_i32_1 = arith.constant 0 : i32
    %c0_i32_2 = arith.constant 0 : i32
    return %arg0, %c0_i32, %c0_i32_0, %c0_i32_1 : i32, i32, i32, i32
  }
}

</mosaic_0001>

<bundles_post_ra>
// kernel: tpu_custom_call.1
= control target key start
LH: loop header
LB: loop body
LE: loop exit
PB: predicated region body
PF: predicated region fallthrough
CT: control target
= control target key end

     0   :  { %8 = vsyncpa [#allocation6], 0  ;;  %s474_s0 = inlined_call_operand.hbm [shape: f32[16,128], index: 0, kind: input, shape index: {}]   ;;  %s475_s1 = inlined_call_operand.hbm [shape: f32[16,128], index: 1, kind: input, shape index: {}]   ;;  %s476_s2 = inlined_call_operand.hbm [shape: f32[16,128], index: 2, kind: input, shape index: {}]   ;;  %s477_s3 = inlined_call_operand.hbm [shape: f32[1,3,8,128], index: 3, kind: output, shape index: {}]  }
   0x1   :  { %9 = vsyncpa [#allocation9], 0 }
   0x2   :  { %10 = vsyncpa [#allocation7], 0  ;;  %s362_s12 = smov [#allocation8]   ;;  %s363_s14 = smov [#allocation5]  }
   0x3   :  { %s36_s13 = sshll.u32 %s362_s12, 4  ;;  %s20_s15 = sshll.u32 %s363_s14, 4  ;;  %s37_s13 = int_to_ptr.vmem [resolvable:$true] %s36_s13  ;;  %s21_s15 = int_to_ptr.vmem [resolvable:$true] %s20_s15 }
   0x4   :  { %s284_s16 = scalar_lea.vmem %s37_s13, 256  ;;  %p289_p1 = scmp.lt.s32.totalorder %s37_s13, %s37_s13 }
   0x5   :  { %p285_p0 = scmp.ne.s32.totalorder %s37_s13, %s284_s16  ;;  %p290_p2 = scmp.lt.s32.totalorder %s284_s16, %s284_s16 }
   0x7   :  { %p291_p3 = por %p290_p2, %p289_p1 }
   0x9   :  { %p292_p4 = pnand %p291_p3, %p285_p0 }
   0xb   :  { %295 = shalt.err (!%p292_p4)
}
   0xc   :  { %s364_s17 = smov 128   ;;  %s365_s18 = smov 8  }
   0xd   :  { %42 = dma.hbm_to_vmem [thread:$0]  %s475_s1, 256, %s37_s13, [#allocation9], %s364_s17, %s364_s17, %s365_s18  }
   0xe   :  { %s304_s21 = scalar_lea.vmem %s21_s15, 256  ;;  %p309_p6 = scmp.lt.s32.totalorder %s21_s15, %s21_s15 }
   0xf   :  { %p305_p5 = scmp.ne.s32.totalorder %s21_s15, %s304_s21  ;;  %p310_p7 = scmp.lt.s32.totalorder %s304_s21, %s304_s21 }
  0x11   :  { %p311_p8 = por %p310_p7, %p309_p6 }
  0x13   :  { %p312_p9 = pnand %p311_p8, %p305_p5 }
  0x15   :  { %315 = shalt.err (!%p312_p9)
}
  0x16   :  { %26 = dma.hbm_to_vmem [thread:$0]  %s474_s0, 256, %s21_s15, [#allocation6], %s364_s17, %s364_s17, %s365_s18  }
  0x17   :  { %s366_s24 = smov [#allocation10]  }
  0x18   :  { %s52_s25 = sshll.u32 %s366_s24, 4  ;;  %s53_s25 = int_to_ptr.vmem [resolvable:$true] %s52_s25 }
  0x19   :  { %s324_s26 = scalar_lea.vmem %s53_s25, 256  ;;  %p329_p11 = scmp.lt.s32.totalorder %s53_s25, %s53_s25 }
  0x1a   :  { %p325_p10 = scmp.ne.s32.totalorder %s53_s25, %s324_s26  ;;  %p330_p12 = scmp.lt.s32.totalorder %s324_s26, %s324_s26 }
  0x1c   :  { %p331_p13 = por %p330_p12, %p329_p11 }
  0x1e   :  { %p332_p0 = pnand %p331_p13, %p325_p10 }
  0x20   :  { %335 = shalt.err (!%p332_p0)
}
  0x21   :  { %58 = dma.hbm_to_vmem [thread:$0]  %s476_s2, 256, %s53_s25, [#allocation9], %s364_s17, %s364_s17, %s365_s18  }
  0x22   :  { %356 = dma.done.wait [#allocation6], 256  }
  0x23   :  { %357 = vsyncadd [#allocation6], 4294967040 }
  0x24   :  { %358 = dma.done.wait [#allocation9], 512  }
  0x25   :  { %359 = vsyncadd [#allocation9], 4294966784  ;;  %v81_v0 = vld [vmem:[#allocation5] sm:$0xff]  ;;  %v82_v1 = vld [vmem:[#allocation5 + $0x8] sm:$0xff]  ;;  %s367_s0 = smov [#allocation11]  }
  0x26   :  { %v83_v2 = vld [vmem:[#allocation8] sm:$0xff]  ;;  %v84_v3 = vld [vmem:[#allocation8 + $0x8] sm:$0xff]  ;;  %v85_v4 = vld [vmem:[#allocation10] sm:$0xff]  ;;  %s237_s2 = sshll.u32 %s367_s0, 4  ;;  %s238_s2 = int_to_ptr.vmem [resolvable:$true] %s237_s2 }
  0x27   :  { %v86_v5 = vld [vmem:[#allocation10 + $0x8] sm:$0xff]  ;;  %v87_v6 = vsub.f32 %v81_v0, %v83_v2  ;;  %v88_v7 = vsub.f32 %v82_v1, %v84_v3  ;;  %256 = vrcp.f32 %v85_v4  ;;  %s336_s28 = scalar_lea.vmem %s238_s2, 384  ;;  %p341_p2 = scmp.lt.s32.totalorder %s238_s2, %s238_s2 }
  0x28   :  { %258 = vrcp.f32 %v86_v5  ;;  %p337_p1 = scmp.ne.s32.totalorder %s238_s2, %s336_s28  ;;  %p342_p3 = scmp.lt.s32.totalorder %s336_s28, %s336_s28 }
  0x29   :  { %v89_v8 = vmul.f32 %v87_v6, %v87_v6  ;;  %v91_v9 = vand.u32 2147483647, %v87_v6  ;;  %v90_v10 = vmul.f32 %v88_v7, %v88_v7  ;;  %v92_v11 = vand.u32 2147483647, %v88_v7 }
  0x2a   :  { %p343_p4 = por %p342_p3, %p341_p2 }
  0x2b   :  { %v210_v12 = vadd.f32 %v90_v10, %v89_v8  ;;  %v214_v13 = vadd.f32 %v92_v11, %v91_v9 }
  0x2c   :  { %p344_p5 = pnand %p343_p4, %p337_p1 }
  0x2d   :  { %225 = vst [vmem:[#allocation11] sm:$0xff] %v210_v12  ;;  %228 = vst [vmem:[#allocation11 + $0x8] sm:$0xff] %v214_v13 }
  0x34   :  { %v257_v14 = vpop.eup %256 }
  0x35   :  { %v259_v15 = vpop.eup %258  ;;  %v95_v16 = vmul.f32 %v257_v14, %v85_v4 }
  0x36   :  { %v96_v17 = vmul.f32 %v259_v15, %v86_v5 }
  0x37   :  { %v97_v18 = vsub.f32 2.0, %v95_v16 }
  0x38   :  { %v98_v19 = vsub.f32 2.0, %v96_v17 }
  0x39   :  { %v99_v20 = vmul.f32 %v257_v14, %v97_v18 }
  0x3a   :  { %v100_v21 = vmul.f32 %v259_v15, %v98_v19 }
  0x3b   :  { %v101_v22 = vmul.f32 %v99_v20, %v83_v2  ;;  %v105_v23 = vmul.f32 %v99_v20, %v81_v0 }
  0x3c   :  { %v102_v24 = vmul.f32 %v100_v21, %v84_v3  ;;  %v106_v25 = vmul.f32 %v100_v21, %v82_v1 }
  0x3d   :  { %v406_v26 = vadd.f32 1e-06, %v101_v22  ;;  %v408_v27 = vadd.f32 1e-06, %v105_v23 }
  0x3e   :  { %v410_v28 = vadd.f32 1e-06, %v102_v24  ;;  %v412_v29 = vadd.f32 1e-06, %v106_v25 }
  0x3f   :  { %260 = vlog2.f32 %v408_v27  ;;  %v119_v30 = vadd.f32 60.458332, %v406_v26  ;;  %v149_v31 = vadd.f32 36.0, %v406_v26 }
  0x40   :  { %262 = vlog2.f32 %v412_v29  ;;  %v120_v32 = vadd.f32 60.458332, %v410_v28  ;;  %v150_v33 = vadd.f32 36.0, %v410_v28 }
  0x41   :  { %v121_v34 = vmul.f32 %v119_v30, %v406_v26  ;;  %v151_v35 = vmul.f32 %v149_v31, %v406_v26  ;;  %v117_v30 = vadd.f32 7.5, %v406_v26  ;;  %v118_v31 = vadd.f32 7.5, %v410_v28 }
  0x42   :  { %v122_v36 = vmul.f32 %v120_v32, %v410_v28  ;;  %v152_v37 = vmul.f32 %v150_v33, %v410_v28 }
  0x43   :  { %v123_v38 = vadd.f32 1599.0425, %v121_v34  ;;  %v153_v39 = vadd.f32 546.0, %v151_v35 }
  0x44   :  { %v124_v40 = vadd.f32 1599.0425, %v122_v36  ;;  %v154_v41 = vadd.f32 546.0, %v152_v37 }
  0x45   :  { %v125_v42 = vmul.f32 %v123_v38, %v406_v26  ;;  %v155_v43 = vmul.f32 %v153_v39, %v406_v26 }
  0x46   :  { %v126_v44 = vmul.f32 %v124_v40, %v410_v28  ;;  %v156_v45 = vmul.f32 %v154_v41, %v410_v28 }
  0x47   :  { %v127_v46 = vadd.f32 24165.51, %v125_v42  ;;  %v157_v47 = vadd.f32 4536.0, %v155_v43 }
  0x48   :  { %v128_v48 = vadd.f32 24165.51, %v126_v44  ;;  %v158_v49 = vadd.f32 4536.0, %v156_v45 }
  0x49   :  { %v129_v50 = vmul.f32 %v127_v46, %v406_v26  ;;  %v159_v51 = vmul.f32 %v157_v47, %v406_v26 }
  0x4a   :  { %v130_v52 = vmul.f32 %v128_v48, %v410_v28  ;;  %v160_v53 = vmul.f32 %v158_v49, %v410_v28 }
  0x4b   :  { %v161_v54 = vadd.f32 22449.0, %v159_v51  ;;  %v131_v59 = vadd.f32 228235.22, %v129_v50 }
  0x4c   :  { %v261_v55 = vpop.eup %260  ;;  %v162_v56 = vadd.f32 22449.0, %v160_v53  ;;  %v132_v62 = vadd.f32 228235.22, %v130_v52  ;;  %v189_v52 = vadd.f32 0.5, %v406_v26 }
  0x4d   :  { %v263_v57 = vpop.eup %262  ;;  %v110_v58 = vmul.f32 0.6931472, %v261_v55  ;;  %v163_v60 = vmul.f32 %v161_v54, %v406_v26  ;;  %v133_v5 = vmul.f32 %v131_v59, %v406_v26  ;;  %v190_v54 = vadd.f32 0.5, %v410_v28 }
  0x4e   :  { %v112_v61 = vmul.f32 0.6931472, %v263_v57  ;;  %v164_v63 = vmul.f32 %v162_v56, %v410_v28  ;;  %v134_v8 = vmul.f32 %v132_v62, %v410_v28 }
  0x4f   :  { %v435_v0 = vmul.f32 %v110_v58, %v406_v26  ;;  %v165_v1 = vadd.f32 67284.0, %v163_v60  ;;  %v135_v12 = vadd.f32 1379496.3, %v133_v5 }
  0x50   :  { %v438_v2 = vmul.f32 %v112_v61, %v410_v28  ;;  %v166_v3 = vadd.f32 67284.0, %v164_v63  ;;  %v136_v14 = vadd.f32 1379496.3, %v134_v8 }
  0x51   :  { %v115_v4 = vsub.f32 %v435_v0, %v408_v27  ;;  %v167_v6 = vmul.f32 %v165_v1, %v406_v26  ;;  %v137_v18 = vmul.f32 %v135_v12, %v406_v26 }
  0x52   :  { %v116_v7 = vsub.f32 %v438_v2, %v412_v29  ;;  %v168_v9 = vmul.f32 %v166_v3, %v410_v28  ;;  %v138_v20 = vmul.f32 %v136_v14, %v410_v28 }
  0x53   :  { %v169_v10 = vadd.f32 118124.0, %v167_v6  ;;  %v139_v24 = vadd.f32 5210869.0, %v137_v18 }
  0x54   :  { %v170_v11 = vadd.f32 118124.0, %v168_v9  ;;  %v140_v25 = vadd.f32 5210869.0, %v138_v20 }
  0x55   :  { %v171_v13 = vmul.f32 %v169_v10, %v406_v26  ;;  %v141_v32 = vmul.f32 %v139_v24, %v406_v26 }
  0x56   :  { %v172_v15 = vmul.f32 %v170_v11, %v410_v28  ;;  %v142_v33 = vmul.f32 %v140_v25, %v410_v28 }
  0x57   :  { %v173_v16 = vadd.f32 109584.0, %v171_v13  ;;  %v143_v34 = vadd.f32 11246929.0, %v141_v32 }
  0x58   :  { %v174_v17 = vadd.f32 109584.0, %v172_v15  ;;  %v144_v35 = vadd.f32 11246929.0, %v142_v33 }
  0x59   :  { %v175_v19 = vmul.f32 %v173_v16, %v406_v26  ;;  %v145_v36 = vmul.f32 %v143_v34, %v406_v26 }
  0x5a   :  { %v176_v21 = vmul.f32 %v174_v17, %v410_v28  ;;  %v146_v38 = vmul.f32 %v144_v35, %v410_v28 }
  0x5b   :  { %v177_v22 = vadd.f32 40320.0, %v175_v19  ;;  %v147_v42 = vadd.f32 10619610.0, %v145_v36 }
  0x5c   :  { %v178_v23 = vadd.f32 40320.0, %v176_v21  ;;  %v148_v44 = vadd.f32 10619610.0, %v146_v38 }
  0x5d   :  { %264 = vrcp.f32 %v177_v22 }
  0x5e   :  { %266 = vrcp.f32 %v178_v23 }
  0x5f   :  { %268 = vlog2.f32 %v117_v30 }
  0x60   :  { %270 = vlog2.f32 %v118_v31 }
  0x6a   :  { %v265_v37 = vpop.eup %264 }
  0x6b   :  { %v267_v39 = vpop.eup %266  ;;  %v181_v40 = vmul.f32 %v265_v37, %v177_v22 }
  0x6c   :  { %v182_v41 = vmul.f32 %v267_v39, %v178_v23  ;;  %v269_v47 = vpop.eup %268 }
  0x6d   :  { %v183_v43 = vsub.f32 2.0, %v181_v40  ;;  %v271_v49 = vpop.eup %270  ;;  %v192_v53 = vmul.f32 0.6931472, %v269_v47 }
  0x6e   :  { %v184_v45 = vsub.f32 2.0, %v182_v41  ;;  %v194_v55 = vmul.f32 0.6931472, %v271_v49 }
  0x6f   :  { %v185_v46 = vmul.f32 %v265_v37, %v183_v43  ;;  %v195_v56 = vmul.f32 %v192_v53, %v189_v52 }
  0x70   :  { %v186_v48 = vmul.f32 %v267_v39, %v184_v45  ;;  %v196_v57 = vmul.f32 %v194_v55, %v190_v54 }
  0x71   :  { %v187_v50 = vmul.f32 %v185_v46, %v147_v42  ;;  %v197_v58 = vadd.f32 0.9189385, %v195_v56 }
  0x72   :  { %v188_v51 = vmul.f32 %v186_v48, %v148_v44  ;;  %v198_v59 = vadd.f32 0.9189385, %v196_v57 }
  0x73   :  { %272 = vlog2.f32 %v187_v50  ;;  %v199_v60 = vsub.f32 %v197_v58, %v117_v30 }
  0x74   :  { %274 = vlog2.f32 %v188_v51  ;;  %v200_v62 = vsub.f32 %v198_v59, %v118_v31 }
  0x80   :  { %v273_v61 = vpop.eup %272 }
  0x81   :  { %v275_v63 = vpop.eup %274  ;;  %v202_v1 = vmul.f32 0.6931472, %v273_v61 }
  0x82   :  { %v204_v3 = vmul.f32 0.6931472, %v275_v63 }
  0x83   :  { %v205_v5 = vadd.f32 %v202_v1, %v199_v60 }
  0x84   :  { %v206_v6 = vadd.f32 %v204_v3, %v200_v62 }
  0x85   :  { %v207_v26 = vsub.f32 %v115_v4, %v205_v5 }
  0x86   :  { %v208_v28 = vsub.f32 %v116_v7, %v206_v6 }
  0x88   :  { %v218_v8 = vadd.f32 %v208_v28, %v207_v26 }
  0x8a   :  { %231 = vst [vmem:[#allocation11 + $0x10] sm:$0xff] %v218_v8 }
  0x8b   :  { %347 = shalt.err (!%p344_p5)
}
  0x8c   :  { %243 = dma.vmem_to_hbm [thread:$0]  %s238_s2, 384, %s477_s3, [#allocation7], %s364_s17, %s364_s17, %s365_s18  }
  0x8d   :  { %360 = dma.done.wait [#allocation7], 384  }
  0x8e   :  { %361 = vsyncadd [#allocation7], 4294966912 }
  0x8f   :  { %247 = vsyncpa [#allocation6], 1 }
  0x90   :  { %248 = vsyncpa [#allocation9], 1 }
  0x91   :  { %249 = vsyncpa [#allocation7], 1 }

</bundles_post_ra>
